<compile_context>
chip_gen: v6e
topology: v6e:2x2x1
jax: 0.10.0
libtpu: 0.0.40
codegen_flags: <defaults>
</compile_context>

<pallas_src>
import functools

import jax
import jax.numpy as jnp
from jax.experimental import pallas as pl
from jax.experimental.pallas import tpu as pltpu


def _mlp_fused_kernel(x_ref, *refs):
    """Fused Linear(+ReLU) chain over one (tm, d_in) batch tile.

    refs = (w1, b1, w2, b2, ..., wN, bN, out).
    Weights are bf16 (MXU-native), biases f32.  Accumulation, bias add and
    ReLU are done in f32; only the matmul inputs are downcast to bf16.
    """
    o_ref = refs[-1]
    param_refs = refs[:-1]
    n_layers = len(param_refs) // 2

    h = x_ref[...].astype(jnp.float32)
    for i in range(n_layers):
        w = param_refs[2 * i][...]        # (d_in, d_out) bf16, VMEM-resident
        b = param_refs[2 * i + 1][...]    # (1, d_out) f32 -> broadcasts over rows
        h = jnp.dot(h.astype(jnp.bfloat16), w,
                    preferred_element_type=jnp.float32) + b
        if i < n_layers - 1:              # ReLU on all but the final layer
            h = jnp.maximum(h, 0.0)
        # nn.Dropout is identity at inference time -> no-op here.
        # TODO(synk): training-mode dropout (pltpu.prng_random_bits mask) not implemented.
    o_ref[...] = h.astype(o_ref.dtype)


def _round_up(n, m):
    return ((n + m - 1) // m) * m


@jax.jit
def mlp_forward(x, params):
    """Forward pass: Linear -> ReLU for all but the last layer, Linear last.

    x: (B, d_in) f32.
    params: list of (w, b) with w: (d_in, d_out) bf16, b: (1, d_out) f32.
    """
    B, d_in = x.shape
    flat = []
    for w, b in params:
        flat.append(w)
        flat.append(b)
    d_out = flat[-2].shape[1]

    # Batch tile: >=512 rows when the batch is large, rounded/capped for small
    # batches; always a multiple of 8 (sublane constraint).
    tm = min(512, _round_up(B, 8))
    B_pad = _round_up(B, tm)
    x_p = x if B_pad == B else jnp.pad(x, ((0, B_pad - B), (0, 0)))
    grid = (B_pad // tm,)

    # Activations/output tile over the batch; params stay block-(0,0) resident.
    act_spec = pl.BlockSpec((tm, d_in), lambda i: (i, 0))
    param_specs = [pl.BlockSpec(p.shape, lambda i: (0, 0)) for p in flat]
    out_spec = pl.BlockSpec((tm, d_out), lambda i: (i, 0))

    flops = sum(2 * B_pad * w.shape[0] * w.shape[1] for w in flat[0::2])
    bytes_accessed = (
        x_p.size * x_p.dtype.itemsize
        + sum(a.size * a.dtype.itemsize for a in flat)
        + B_pad * d_out * jnp.dtype(x.dtype).itemsize
    )

    out = pl.pallas_call(
        _mlp_fused_kernel,
        out_shape=jax.ShapeDtypeStruct((B_pad, d_out), x.dtype),
        grid=grid,
        in_specs=[act_spec] + param_specs,
        out_specs=out_spec,
        compiler_params=pltpu.CompilerParams(
            dimension_semantics=("parallel",),      # v7x megacore; no-op on 1-TC chips
            vmem_limit_bytes=32 * 1024 * 1024,      # explicit; safe on v5e/v6e/v7x
        ),
        cost_estimate=pl.CostEstimate(
            flops=flops, transcendentals=0, bytes_accessed=bytes_accessed
        ),
    )(x_p, *flat)

    return out if B_pad == B else out[:B]


def init_mlp_params(layer_sizes, key):
    """Init mimicking PyTorch nn.Linear default U(-1/sqrt(fan_in), +1/sqrt(fan_in)).

    Weights stored bf16 (MXU-native), transposed to (in, out); biases f32,
    pre-reshaped to (1, d_out) so no per-call reshape is needed.
    """
    params = []
    for i in range(len(layer_sizes) - 1):
        fan_in, fan_out = layer_sizes[i], layer_sizes[i + 1]
        key, kw, kb = jax.random.split(key, 3)
        bound = 1.0 / (fan_in ** 0.5)
        w = jax.random.uniform(kw, (fan_in, fan_out), jnp.float32, -bound, bound)
        b = jax.random.uniform(kb, (1, fan_out), jnp.float32, -bound, bound)
        params.append((w.astype(jnp.bfloat16), b))
    return params


def _reference(x, params):
    """Plain-JAX reference with the same bf16-input / f32-accumulate math."""
    h = x.astype(jnp.float32)
    for i, (w, b) in enumerate(params):
        h = jnp.dot(h.astype(jnp.bfloat16), w, preferred_element_type=jnp.float32) + b
        if i < len(params) - 1:
            h = jnp.maximum(h, 0.0)
    return h


if __name__ == "__main__":
    key = jax.random.PRNGKey(0)
    k_x, k_x2, k_p = jax.random.split(key, 3)

    # Small shapes consistent with the module: batch=8, layer_sizes=[16, 32, 32, 4]
    layer_sizes = [16, 32, 32, 4]
    params = init_mlp_params(layer_sizes, k_p)

    # Case 1: tiny batch (single grid point).
    x = jax.random.normal(k_x, (8, layer_sizes[0]), dtype=jnp.float32)
    out = jax.block_until_ready(mlp_forward(x, params))
    ref = _reference(x, params)
    assert out.shape == (8, layer_sizes[-1])
    assert jnp.allclose(out, ref, atol=1e-3, rtol=1e-3)

    # Case 2: non-multiple batch exercising the tiled grid + padding path.
    x2 = jax.random.normal(k_x2, (520, layer_sizes[0]), dtype=jnp.float32)
    out2 = jax.block_until_ready(mlp_forward(x2, params))
    ref2 = _reference(x2, params)
    assert out2.shape == (520, layer_sizes[-1])
    assert jnp.allclose(out2, ref2, atol=1e-3, rtol=1e-3)

    print("KERNEL_OK")
</pallas_src>

<mosaic_0001>
module attributes {stable_mosaic.version = 11 : i64} {
  func.func @_mlp_fused_kernel(%arg0: i32, %arg1: memref<8x16xf32, #tpu.memory_space<vmem>>, %arg2: memref<16x32xbf16, #tpu.memory_space<vmem>>, %arg3: memref<1x32xf32, #tpu.memory_space<vmem>>, %arg4: memref<32x32xbf16, #tpu.memory_space<vmem>>, %arg5: memref<1x32xf32, #tpu.memory_space<vmem>>, %arg6: memref<32x4xbf16, #tpu.memory_space<vmem>>, %arg7: memref<1x4xf32, #tpu.memory_space<vmem>>, %arg8: memref<8x4xf32, #tpu.memory_space<vmem>>) attributes {dimension_semantics = [#tpu.dimension_semantics<parallel>], iteration_bounds = array<i64: 1>, scalar_prefetch = 0 : i64, scratch_operands = 0 : i64, tpu.core_type = #tpu.core_type<tc>, window_params = [{transform_indices = @transform_0, window_bounds = array<i64: 8, 16>}, {pipeline_mode = #tpu.pipeline_mode<synchronous>, transform_indices = @transform_1, window_bounds = array<i64: 16, 32>}, {pipeline_mode = #tpu.pipeline_mode<synchronous>, transform_indices = @transform_2, window_bounds = array<i64: 1, 32>}, {pipeline_mode = #tpu.pipeline_mode<synchronous>, transform_indices = @transform_3, window_bounds = array<i64: 32, 32>}, {pipeline_mode = #tpu.pipeline_mode<synchronous>, transform_indices = @transform_4, window_bounds = array<i64: 1, 32>}, {pipeline_mode = #tpu.pipeline_mode<synchronous>, transform_indices = @transform_5, window_bounds = array<i64: 32, 4>}, {pipeline_mode = #tpu.pipeline_mode<synchronous>, transform_indices = @transform_6, window_bounds = array<i64: 1, 4>}, {transform_indices = @transform_7, window_bounds = array<i64: 8, 4>}]} {
    %c0 = arith.constant 0 : index
    %c0_0 = arith.constant 0 : index
    %0 = vector.load %arg1[%c0, %c0_0] : memref<8x16xf32, #tpu.memory_space<vmem>>, vector<8x16xf32>
    %c0_1 = arith.constant 0 : index
    %c0_2 = arith.constant 0 : index
    %1 = vector.load %arg2[%c0_1, %c0_2] : memref<16x32xbf16, #tpu.memory_space<vmem>>, vector<16x32xbf16>
    %c0_3 = arith.constant 0 : index
    %c0_4 = arith.constant 0 : index
    %2 = vector.load %arg3[%c0_3, %c0_4] : memref<1x32xf32, #tpu.memory_space<vmem>>, vector<1x32xf32>
    %3 = arith.truncf %0 : vector<8x16xf32> to vector<8x16xbf16>
    %cst = arith.constant dense<0.000000e+00> : vector<8x32xf32>
    %4 = tpu.matmul %3, %1, %cst {dimension_numbers = #tpu.dot_dimension_numbers<[1], [0], [0], [1], [0, 0, 1, 1], [], []>} : vector<8x16xbf16>, vector<16x32xbf16>, vector<8x32xf32> -> vector<8x32xf32>
    %5 = vector.broadcast %2 : vector<1x32xf32> to vector<8x32xf32>
    %6 = arith.addf %4, %5 : vector<8x32xf32>
    %cst_5 = arith.constant 0.000000e+00 : f32
    %7 = vector.broadcast %cst_5 : f32 to vector<8x32xf32>
    %8 = arith.maximumf %6, %7 : vector<8x32xf32>
    %c0_6 = arith.constant 0 : index
    %c0_7 = arith.constant 0 : index
    %9 = vector.load %arg4[%c0_6, %c0_7] : memref<32x32xbf16, #tpu.memory_space<vmem>>, vector<32x32xbf16>
    %c0_8 = arith.constant 0 : index
    %c0_9 = arith.constant 0 : index
    %10 = vector.load %arg5[%c0_8, %c0_9] : memref<1x32xf32, #tpu.memory_space<vmem>>, vector<1x32xf32>
    %11 = arith.truncf %8 : vector<8x32xf32> to vector<8x32xbf16>
    %cst_10 = arith.constant dense<0.000000e+00> : vector<8x32xf32>
    %12 = tpu.matmul %11, %9, %cst_10 {dimension_numbers = #tpu.dot_dimension_numbers<[1], [0], [0], [1], [0, 0, 1, 1], [], []>} : vector<8x32xbf16>, vector<32x32xbf16>, vector<8x32xf32> -> vector<8x32xf32>
    %13 = vector.broadcast %10 : vector<1x32xf32> to vector<8x32xf32>
    %14 = arith.addf %12, %13 : vector<8x32xf32>
    %cst_11 = arith.constant 0.000000e+00 : f32
    %15 = vector.broadcast %cst_11 : f32 to vector<8x32xf32>
    %16 = arith.maximumf %14, %15 : vector<8x32xf32>
    %c0_12 = arith.constant 0 : index
    %c0_13 = arith.constant 0 : index
    %17 = vector.load %arg6[%c0_12, %c0_13] : memref<32x4xbf16, #tpu.memory_space<vmem>>, vector<32x4xbf16>
    %c0_14 = arith.constant 0 : index
    %c0_15 = arith.constant 0 : index
    %18 = vector.load %arg7[%c0_14, %c0_15] : memref<1x4xf32, #tpu.memory_space<vmem>>, vector<1x4xf32>
    %19 = arith.truncf %16 : vector<8x32xf32> to vector<8x32xbf16>
    %cst_16 = arith.constant dense<0.000000e+00> : vector<8x4xf32>
    %20 = tpu.matmul %19, %17, %cst_16 {dimension_numbers = #tpu.dot_dimension_numbers<[1], [0], [0], [1], [0, 0, 1, 1], [], []>} : vector<8x32xbf16>, vector<32x4xbf16>, vector<8x4xf32> -> vector<8x4xf32>
    %21 = vector.broadcast %18 : vector<1x4xf32> to vector<8x4xf32>
    %22 = arith.addf %20, %21 : vector<8x4xf32>
    %c0_17 = arith.constant 0 : index
    %c0_18 = arith.constant 0 : index
    %23 = vector.load %arg8[%c0_17, %c0_18] : memref<8x4xf32, #tpu.memory_space<vmem>>, vector<8x4xf32>
    tpu.vector_store %arg8[%c0_17, %c0_18], %22 {strides = array<i32>} : memref<8x4xf32, #tpu.memory_space<vmem>>, vector<8x4xf32>,
    return
  }
  func.func @transform_0(%arg0: i32) -> (i32, i32) {
    %c0_i32 = arith.constant 0 : i32
    %c0_i32_0 = arith.constant 0 : i32
    return %arg0, %c0_i32 : i32, i32
  }
  func.func @transform_1(%arg0: i32) -> (i32, i32) {
    %c0_i32 = arith.constant 0 : i32
    %c0_i32_0 = arith.constant 0 : i32
    %c0_i32_1 = arith.constant 0 : i32
    return %c0_i32, %c0_i32_0 : i32, i32
  }
  func.func @transform_2(%arg0: i32) -> (i32, i32) {
    %c0_i32 = arith.constant 0 : i32
    %c0_i32_0 = arith.constant 0 : i32
    %c0_i32_1 = arith.constant 0 : i32
    return %c0_i32, %c0_i32_0 : i32, i32
  }
  func.func @transform_3(%arg0: i32) -> (i32, i32) {
    %c0_i32 = arith.constant 0 : i32
    %c0_i32_0 = arith.constant 0 : i32
    %c0_i32_1 = arith.constant 0 : i32
    return %c0_i32, %c0_i32_0 : i32, i32
  }
  func.func @transform_4(%arg0: i32) -> (i32, i32) {
    %c0_i32 = arith.constant 0 : i32
    %c0_i32_0 = arith.constant 0 : i32
    %c0_i32_1 = arith.constant 0 : i32
    return %c0_i32, %c0_i32_0 : i32, i32
  }
  func.func @transform_5(%arg0: i32) -> (i32, i32) {
    %c0_i32 = arith.constant 0 : i32
    %c0_i32_0 = arith.constant 0 : i32
    %c0_i32_1 = arith.constant 0 : i32
    return %c0_i32, %c0_i32_0 : i32, i32
  }
  func.func @transform_6(%arg0: i32) -> (i32, i32) {
    %c0_i32 = arith.constant 0 : i32
    %c0_i32_0 = arith.constant 0 : i32
    %c0_i32_1 = arith.constant 0 : i32
    return %c0_i32, %c0_i32_0 : i32, i32
  }
  func.func @transform_7(%arg0: i32) -> (i32, i32) {
    %c0_i32 = arith.constant 0 : i32
    %c0_i32_0 = arith.constant 0 : i32
    return %arg0, %c0_i32 : i32, i32
  }
}

</mosaic_0001>

<bundles_post_ra>
// kernel: mlp_forward.1
= control target key start
LH: loop header
LB: loop body
LE: loop exit
PB: predicated region body
PF: predicated region fallthrough
CT: control target
= control target key end

     0   :  { %12 = vsyncpa [#allocation3], 0  ;;  %s431_s0 = inlined_call_operand.hbm [shape: f32[8,16], index: 0, kind: input, shape index: {}]   ;;  %s432_s1 = inlined_call_operand.hbm [shape: bf16[16,32], index: 1, kind: input, shape index: {}]   ;;  %s433_s2 = inlined_call_operand.vmem [shape: f32[1,32], index: 2, kind: input, shape index: {}]   ;;  %s434_s3 = inlined_call_operand.vmem [shape: bf16[32,32], index: 3, kind: input, shape index: {}]   ;;  %s435_s4 = inlined_call_operand.vmem [shape: f32[1,32], index: 4, kind: input, shape index: {}]   ;;  %s436_s5 = inlined_call_operand.vmem [shape: bf16[32,4], index: 5, kind: input, shape index: {}]   ;;  %s437_s6 = inlined_call_operand.vmem [shape: f32[1,4], index: 6, kind: input, shape index: {}]   ;;  %s438_s7 = inlined_call_operand.vmem [shape: f32[8,4], index: 7, kind: output, shape index: {}]  }
   0x1   :  { %13 = vsyncpa [#allocation5], 0  ;;  %s355_s24 = smov [#allocation2]   ;;  %s356_s26 = smov [#allocation4]  }
   0x2   :  { %s20_s25 = sshll.u32 %s355_s24, 4  ;;  %s29_s27 = sshll.u32 %s356_s26, 4  ;;  %s21_s25 = int_to_ptr.vmem [resolvable:$true] %s20_s25  ;;  %s30_s27 = int_to_ptr.vmem [resolvable:$true] %s29_s27 }
   0x3   :  { %s319_s28 = scalar_lea.vmem %s21_s25, 128  ;;  %p324_p1 = scmp.lt.s32.totalorder %s21_s25, %s21_s25 }
   0x4   :  { %p320_p0 = scmp.ne.s32.totalorder %s21_s25, %s319_s28  ;;  %p325_p2 = scmp.lt.s32.totalorder %s319_s28, %s319_s28 }
   0x6   :  { %p326_p3 = por %p325_p2, %p324_p1 }
   0x8   :  { %p327_p4 = pnand %p326_p3, %p320_p0 }
   0xa   :  { %330 = shalt.err (!%p327_p4)
}
   0xb   :  { %23 = dma.hbm_to_vmem [thread:$0]  %s431_s0, 128, %s21_s25, [#allocation3]  }
   0xc   :  { %s339_s8 = scalar_lea.vmem %s30_s27, 128  ;;  %p344_p6 = scmp.lt.s32.totalorder %s30_s27, %s30_s27 }
   0xd   :  { %p340_p5 = scmp.ne.s32.totalorder %s30_s27, %s339_s8  ;;  %p345_p7 = scmp.lt.s32.totalorder %s339_s8, %s339_s8 }
   0xf   :  { %p346_p8 = por %p345_p7, %p344_p6 }
  0x11   :  { %p347_p9 = pnand %p346_p8, %p340_p5 }
  0x13   :  { %350 = shalt.err (!%p347_p9)
}
  0x14   :  { %s357_s9 = smov 64   ;;  %s358_s10 = smov 4  }
  0x15   :  { %35 = dma.hbm_to_vmem [thread:$0]  %s432_s1, 128, %s30_s27, [#allocation5], %s357_s9, %s357_s9, %s358_s10  }
  0x16   :  { %351 = dma.done.wait [#allocation3], 128  }
  0x17   :  { %352 = vsyncadd [#allocation3], 4294967168 }
  0x18   :  { %353 = dma.done.wait [#allocation5], 128  }
  0x19   :  { %354 = vsyncadd [#allocation5], 4294967168  ;;  %v359_v0 = vmov 0.0   ;;  %vm360_vm0 = vmmov 0   ;;  %v306_v1 = vld [vmem:[#allocation4] sm:$0xff]   ;;  %v53_v2 = vld [vmem:[#allocation2] sm:$0xff] }
  0x1a   :  { %278 = vmatprep.subr.bf16.mxu0 %v359_v0  ;;  %280 = vmatprep.mubr.msk.bf16.mxu0 %vm360_vm0, %v359_v0  ;;  %vm70_vm1 = vcmask 130048   ;;  %v57_v3 = vpack.c.bf16 %v53_v2, %v53_v2  ;;  %v307_v4 = vld [vmem:[%s434_s3 + $0x8] sm:$0xff]   ;;  %v308_v5 = vld [vmem:[%s434_s3] sm:$0xff]   ;;  %vm139_vm2 = vcmask 261120   ;;  %vm251_vm3 = vcmask 31744  }
  0x1b   :  { %284 = vmatprep.subr.bf16.mxu1 %v359_v0  ;;  %288 = vmatprep.mubr.msk.bf16.mxu1 %vm360_vm0, %v359_v0  ;;  %v309_v6 = vld [vmem:[%s436_s5 + $0x8] sm:$0xff]   ;;  %v259_v7 = vld [vmem:[%s433_s2] ss:$0 sm:$0xff] }
  0x1c   :  { %279 = vmatpush3.bf16.msra.mxu0 %v306_v1  ;;  %285 = vmatpush3.bf16.msra.mxu1 %v307_v4  ;;  %v310_v15 = vld [vmem:[%s436_s5] sm:$0xff]  }
  0x1d   :  { %292 = vmatprep.subr.bf16.mxu0 %v359_v0  ;;  %286 = vmatprep.subr.bf16.mxu1 %v359_v0  ;;  %v262_v16 = vld [vmem:[%s435_s4] ss:$0 sm:$0xff] }
  0x1e   :  { %v266_v24 = vld [vmem:[%s437_s6] ss:$0 sm:$0xff] }
  0x1f   :  { %281 = vmatmul.mubr.msk.bf16.vlgmr.msra.gmra.mxu0 %vm70_vm1, %v57_v3 }
  0x20   :  { %296 = vmatprep.mubr.msk.bf16.mxu0 %vm360_vm0, %v359_v0  ;;  %287 = vmatpush3.bf16.msra.mxu1 %v308_v5 }
  0x21   :  { %293 = vmatpush3.bf16.msra.mxu0 %v309_v6 }
  0x22   :  { %294 = vmatprep.subr.bf16.mxu0 %v359_v0 }
  0x25   :  { %295 = vmatpush3.bf16.msra.mxu0 %v310_v15 }
  0xdf   :  { %v108_v8 = vpop.f32.mrf.mxu0 }
  0xe0   :  { %v109_v9 = vadd.f32 %v259_v7, %v108_v8 }
  0xe1   :  { %v282_v10 = vpop.f32.mrf.mxu0 }
  0xe2   :  { %v114_v11 = vmax.f32 %v109_v9, 0.0 }
  0xe3   :  { %v111_v12 = vpop.f32.mrf.mxu0 }
  0xe4   :  { %v120_v13 = vpack.c.bf16 %v114_v11, %v114_v11 }
  0xe5   :  { %v283_v14 = vpop.f32.mrf.mxu0 }
  0xe6   :  { %289 = vmatmul.mubr.msk.bf16.vlgmr.msra.gmra.mxu1 %vm139_vm2, %v120_v13 }
 0x1a6   :  { %v177_v17 = vpop.f32.mrf.mxu1 }
 0x1a7   :  { %v178_v18 = vadd.f32 %v262_v16, %v177_v17 }
 0x1a8   :  { %v290_v19 = vpop.f32.mrf.mxu1 }
 0x1a9   :  { %v183_v20 = vmax.f32 %v178_v18, 0.0 }
 0x1aa   :  { %v180_v21 = vpop.f32.mrf.mxu1 }
 0x1ab   :  { %v189_v22 = vpack.c.bf16 %v183_v20, %v183_v20 }
 0x1ac   :  { %v291_v23 = vpop.f32.mrf.mxu1 }
 0x1ad   :  { %297 = vmatmul.mubr.msk.bf16.vlgmr.msra.gmra.mxu0 %vm139_vm2, %v189_v22 }
 0x26d   :  { %v245_v25 = vpop.f32.mrf.mxu0 }
 0x26e   :  { %v246_v26 = vadd.f32 %v266_v24, %v245_v25 }
 0x26f   :  { %v298_v27 = vpop.f32.mrf.mxu0 }
 0x270   :  { %252 = vst.msk [vmem:[%s438_s7] sm:$0xff] %vm251_vm3, %v246_v26 }
 0x271   :  { %v248_v28 = vpop.f32.mrf.mxu0 }
 0x273   :  { %v299_v29 = vpop.f32.mrf.mxu0 }
 0x274   :  { %257 = vsyncpa [#allocation3], 1 }
 0x275   :  { %258 = vsyncpa [#allocation5], 1 }

</bundles_post_ra>
